<compile_context>
chip_gen: v6e
topology: v6e:2x2x1
jax: 0.10.0
libtpu: 0.0.40
codegen_flags: <defaults>
</compile_context>

<pallas_src>
import math

import numpy as np

import jax
import jax.numpy as jnp
from jax import lax
from jax.experimental import pallas as pl
from jax.experimental.pallas import tpu as pltpu

# ---- small synthetic Mistral config (ModelArgs analogue) ----
DIM = 32          # args.dim
HIDDEN_DIM = 64   # args.hidden_dim
N_LAYERS = 2      # args.n_layers
HEAD_DIM = 8      # args.head_dim
N_HEADS = 4       # args.n_heads
N_KV_HEADS = 2    # args.n_kv_heads
N_REP = N_HEADS // N_KV_HEADS
VOCAB = 128       # args.vocab_size
NORM_EPS = 1e-5   # args.norm_eps
ROPE_THETA = 10000.0

Q_W = N_HEADS * HEAD_DIM            # 32
KV_W = N_KV_HEADS * HEAD_DIM        # 16
ROPE_HALF = 4 * HEAD_DIM            # per-head packed [q | k | v | pad] width = 32 lanes
PACK_W = 2 * ROPE_HALF              # + rotated half [q@R | k@R | 0 | 0]     = 64 lanes


# ------------------------- the fused Pallas kernel -------------------------

def mistral_layers_kernel(h0_ref, cs_ref, sn_ref, mask_ref,
                          wqkv_ref, wo_ref, w13_ref, w2_ref, wout_ref,
                          out_ref, h_ref):
    """One grid step == one transformer layer; hidden state h persists in VMEM scratch."""
    layer = pl.program_id(0)

    @pl.when(layer == 0)
    def _init():
        h_ref[...] = h0_ref[...]

    def rms(x):  # RMSNorm gammas are folded into the following packed weights (glue)
        return x * lax.rsqrt(jnp.mean(x * x, axis=-1, keepdims=True) + NORM_EPS)

    h = h_ref[...]                                    # (T, DIM) f32, resident across layers
    cs = cs_ref[...]                                  # (T, 32) f32  [cos|cos|1|0]
    sn = sn_ref[...]                                  # (T, 32) f32  [sin|sin|0|0]

    # ---- attention: h += sum_h  wo_h( softmax(q_h k_h^T + mask) v_h ) ----
    xn = rms(h).astype(jnp.bfloat16)                  # bf16 only at the dot boundary
    xb = jnp.broadcast_to(xn, (N_HEADS,) + xn.shape)  # (H, T, DIM)
    # one batched head-major matmul -> per head [q | k | v | pad | q@R | k@R | 0 | 0]
    y = jnp.einsum("htd,hdw->htw", xb, wqkv_ref[...],
                   preferred_element_type=jnp.float32)            # (H, T, 64) f32
    # fused interleaved-pair RoPE (v passes through: cos=1, sin=0); stays f32
    r = y[..., :ROPE_HALF] * cs + y[..., ROPE_HALF:] * sn         # (H, T, 32)
    q = r[..., 0:HEAD_DIM].astype(jnp.bfloat16)                   # (H, T, 8)
    k = r[..., HEAD_DIM:2 * HEAD_DIM].astype(jnp.bfloat16)        # (H, T, 8)
    v = r[..., 2 * HEAD_DIM:3 * HEAD_DIM].astype(jnp.bfloat16)    # (H, T, 8)
    # 1/sqrt(head_dim) is folded into the q columns of the packed weight.
    s = jnp.einsum("hqd,hkd->hqk", q, k,
                   preferred_element_type=jnp.float32) + mask_ref[...]
    s = s - jnp.max(s, axis=-1, keepdims=True)
    e = jnp.exp(s)
    p = e * pl.reciprocal(jnp.sum(e, axis=-1, keepdims=True), approx=True)
    o = jnp.einsum("hqk,hkd->hqd", p.astype(jnp.bfloat16), v,
                   preferred_element_type=jnp.float32)            # (H, T, 8)
    ow = jnp.einsum("hqd,hdm->hqm", o.astype(jnp.bfloat16), wo_ref[...],
                    preferred_element_type=jnp.float32)           # (H, T, DIM)
    h = h + jnp.sum(ow, axis=0)                                   # combine heads (no concat)

    # ---- SwiGLU feed-forward: h += w2( silu(w1 x) * w3 x ) ----
    # TODO(synk): reference FeedForward has inconsistent w2/w3 shapes (transcription
    # bug); canonical Mistral SwiGLU implemented instead.
    xn2 = rms(h).astype(jnp.bfloat16)
    z = jnp.dot(xn2, w13_ref[...], preferred_element_type=jnp.float32)   # (T, 128)
    a = z[:, :HIDDEN_DIM]
    b = z[:, HIDDEN_DIM:]
    h = h + jnp.dot(((a * jax.nn.sigmoid(a)) * b).astype(jnp.bfloat16), w2_ref[...],
                    preferred_element_type=jnp.float32)

    h_ref[...] = h

    # ---- final RMSNorm (gamma folded into wout) + vocab projection (lane-dense 128) ----
    @pl.when(layer == pl.num_programs(0) - 1)
    def _finalize():
        out_ref[...] = jnp.dot(rms(h).astype(jnp.bfloat16), wout_ref[...],
                               preferred_element_type=jnp.float32)


# ------------------------- wrapper -------------------------

def mistral_forward(input_ids, seqlens, params, packed):
    # forward_partial + output projection; pipeline_rank=0, ranks=1, cache=None.
    assert sum(seqlens) == input_ids.shape[0]
    h0 = params["embedding"][input_ids]               # embedding gather (glue)
    T = h0.shape[0]
    assert T % 8 == 0, "T must be a multiple of the f32 sublane tile (8)"

    operands = (h0, packed["cs"], packed["sn"], packed["mask"],
                packed["wqkv"], packed["wo"], packed["w13"], packed["w2"],
                packed["wout"])

    flops_layer = 2 * (N_HEADS * T * DIM * PACK_W          # fused QKV (+rotated copies)
                       + 2 * N_HEADS * T * T * HEAD_DIM    # scores + PV
                       + N_HEADS * T * HEAD_DIM * DIM      # wo
                       + T * DIM * 2 * HIDDEN_DIM          # w1|w3
                       + T * HIDDEN_DIM * DIM)             # w2
    flops = N_LAYERS * flops_layer + 2 * T * DIM * VOCAB
    transcendentals = N_LAYERS * (N_HEADS * T * T + T * HIDDEN_DIM)
    bytes_accessed = (sum(int(a.size) * a.dtype.itemsize for a in operands)
                      + T * VOCAB * 4)

    grid_spec = pltpu.PrefetchScalarGridSpec(
        num_scalar_prefetch=0,
        grid=(N_LAYERS,),
        in_specs=[
            pl.BlockSpec((T, DIM), lambda l: (0, 0)),             # h0 (consumed at l==0)
            pl.BlockSpec((T, ROPE_HALF), lambda l: (0, 0)),       # cos table
            pl.BlockSpec((T, ROPE_HALF), lambda l: (0, 0)),       # sin table
            pl.BlockSpec((T, T), lambda l: (0, 0)),               # block-diag causal mask
            pl.BlockSpec((None, N_HEADS, DIM, PACK_W), lambda l: (l, 0, 0, 0)),   # wqkv
            pl.BlockSpec((None, N_HEADS, HEAD_DIM, DIM), lambda l: (l, 0, 0, 0)), # wo
            pl.BlockSpec((None, DIM, 2 * HIDDEN_DIM), lambda l: (l, 0, 0)),       # w1|w3
            pl.BlockSpec((None, HIDDEN_DIM, DIM), lambda l: (l, 0, 0)),           # w2
            pl.BlockSpec((DIM, VOCAB), lambda l: (0, 0)),         # wout (used at last l)
        ],
        out_specs=pl.BlockSpec((T, VOCAB), lambda l: (0, 0)),
        scratch_shapes=[pltpu.VMEM((T, DIM), jnp.float32)],       # resident hidden state
    )
    logits = pl.pallas_call(
        mistral_layers_kernel,
        out_shape=jax.ShapeDtypeStruct((T, VOCAB), jnp.float32),
        grid_spec=grid_spec,
        compiler_params=pltpu.CompilerParams(
            dimension_semantics=("arbitrary",),       # layer axis carries state
            vmem_limit_bytes=32 * 1024 * 1024),       # explicit (v7x-safe) VMEM budget
        cost_estimate=pl.CostEstimate(flops=flops,
                                      transcendentals=transcendentals,
                                      bytes_accessed=bytes_accessed),
    )(*operands)
    return logits.astype(jnp.float32)                 # outs.float()


# ------------------------- glue: params / RoPE / weight packing -------------------------

def init_params(key):
    def nrm(k, shape, scale=0.05):
        return scale * jax.random.normal(k, shape, dtype=jnp.float32)

    keys = jax.random.split(key, 2 + N_LAYERS)
    emb = nrm(keys[0], (VOCAB, DIM))
    out_w = nrm(keys[1], (DIM, VOCAB))
    layers = []
    for i in range(N_LAYERS):
        lk = jax.random.split(keys[2 + i], 7)
        layers.append(dict(
            attn_norm=jnp.ones((DIM,), jnp.float32),
            wq=nrm(lk[0], (DIM, Q_W)),
            wk=nrm(lk[1], (DIM, KV_W)),
            wv=nrm(lk[2], (DIM, KV_W)),
            wo=nrm(lk[3], (Q_W, DIM)),
            ffn_norm=jnp.ones((DIM,), jnp.float32),
            w1=nrm(lk[4], (DIM, HIDDEN_DIM)),
            w3=nrm(lk[5], (DIM, HIDDEN_DIM)),
            w2=nrm(lk[6], (HIDDEN_DIM, DIM)),
        ))
    return dict(embedding=emb, layers=layers,
                final_norm=jnp.ones((DIM,), jnp.float32), output=out_w)


def rope_tables(positions):
    # precompute_theta_pos_frequencies -> cos/sin per pair, repeated to full head_dim
    inv_freq = 1.0 / (ROPE_THETA ** (jnp.arange(0, HEAD_DIM, 2, dtype=jnp.float32) / HEAD_DIM))
    angles = positions[:, None].astype(jnp.float32) * inv_freq[None, :]    # (T, Hd/2)
    cos = jnp.repeat(jnp.cos(angles), 2, axis=1)                           # (T, Hd)
    sin = jnp.repeat(jnp.sin(angles), 2, axis=1)
    return cos, sin


def rotate_pairs(x):
    """(x[..., 2i], x[..., 2i+1]) -> (-x[..., 2i+1], x[..., 2i]) along the last axis."""
    x2 = x.reshape(x.shape[:-1] + (-1, 2))
    return jnp.stack([-x2[..., 1], x2[..., 0]], axis=-1).reshape(x.shape)


def block_diag_causal_mask(seqlens):
    """Additive (T, T) mask: causal within each packed sequence, -inf across sequences."""
    # TODO(synk): sliding-window local attention (make_local_attention) not applied.
    T = int(sum(seqlens))
    seg = np.repeat(np.arange(len(seqlens)), np.asarray(seqlens))
    tok = np.arange(T)
    allowed = (seg[:, None] == seg[None, :]) & (tok[None, :] <= tok[:, None])
    return jnp.where(jnp.asarray(allowed), 0.0, -1e30).astype(jnp.float32)


def pack_params(params, positions, seqlens):
    """Head-major, bf16, norm/scale-folded weights + RoPE tables for the kernel."""
    T = positions.shape[0]
    cos, sin = rope_tables(positions)
    ones8 = jnp.ones((T, HEAD_DIM), jnp.float32)
    zeros8 = jnp.zeros((T, HEAD_DIM), jnp.float32)
    cs = jnp.concatenate([cos, cos, ones8, zeros8], axis=1)   # (T, 32) for [q|k|v|pad]
    sn = jnp.concatenate([sin, sin, zeros8, zeros8], axis=1)

    scale = 1.0 / math.sqrt(HEAD_DIM)          # folded into q columns
    zpad = jnp.zeros((DIM, HEAD_DIM), jnp.float32)

    wqkv, wo, w13, w2 = [], [], [], []
    for p in params["layers"]:
        g_attn = p["attn_norm"][:, None]       # fold RMSNorm gamma into the weight rows
        heads = []
        for hq in range(N_HEADS):
            g = hq // N_REP                    # GQA: k/v duplicated per query head
            wq_h = p["wq"][:, hq * HEAD_DIM:(hq + 1) * HEAD_DIM] * scale
            wk_h = p["wk"][:, g * HEAD_DIM:(g + 1) * HEAD_DIM]
            wv_h = p["wv"][:, g * HEAD_DIM:(g + 1) * HEAD_DIM]
            blk = jnp.concatenate(
                [wq_h, wk_h, wv_h, zpad,
                 rotate_pairs(wq_h), rotate_pairs(wk_h), zpad, zpad], axis=1)  # (DIM, 64)
            heads.append(g_attn * blk)
        wqkv.append(jnp.stack(heads, axis=0))                                  # (H, DIM, 64)
        wo.append(p["wo"].reshape(N_HEADS, HEAD_DIM, DIM))                     # (H, 8, DIM)
        g_ffn = p["ffn_norm"][:, None]
        w13.append(g_ffn * jnp.concatenate([p["w1"], p["w3"]], axis=1))        # (DIM, 128)
        w2.append(p["w2"])
    wout = params["final_norm"][:, None] * params["output"]                    # (DIM, 128)
    bf16 = lambda x: x.astype(jnp.bfloat16)
    return dict(cs=cs, sn=sn, mask=block_diag_causal_mask(seqlens),
                wqkv=bf16(jnp.stack(wqkv)), wo=bf16(jnp.stack(wo)),
                w13=bf16(jnp.stack(w13)), w2=bf16(jnp.stack(w2)), wout=bf16(wout))


# ------------------------- pure-JAX reference for verification -------------------------

def _rmsnorm(x, w, eps):
    return (x * lax.rsqrt(jnp.mean(x * x, axis=-1, keepdims=True) + eps)) * w


def _bdot(x, w):
    # mirror the kernel's bf16 MXU feed (bf16 operands, f32 accumulation)
    return jnp.dot(x.astype(jnp.bfloat16), w.astype(jnp.bfloat16),
                   preferred_element_type=jnp.float32)


def reference_forward(input_ids, params, positions, mask):
    cos, sin = rope_tables(positions)
    cos_q = jnp.tile(cos, (1, N_HEADS)); sin_q = jnp.tile(sin, (1, N_HEADS))
    cos_k = jnp.tile(cos, (1, N_KV_HEADS)); sin_k = jnp.tile(sin, (1, N_KV_HEADS))

    h = params["embedding"][input_ids]
    T = h.shape[0]
    for p in params["layers"]:
        xn = _rmsnorm(h, p["attn_norm"], NORM_EPS)
        q = _bdot(xn, p["wq"]); k = _bdot(xn, p["wk"]); v = _bdot(xn, p["wv"])
        q = q * cos_q + rotate_pairs(q) * sin_q
        k = k * cos_k + rotate_pairs(k) * sin_k
        qh = q.reshape(T, N_HEADS, HEAD_DIM).transpose(1, 0, 2)
        kh = jnp.repeat(k.reshape(T, N_KV_HEADS, HEAD_DIM).transpose(1, 0, 2), N_REP, axis=0)
        vh = jnp.repeat(v.reshape(T, N_KV_HEADS, HEAD_DIM).transpose(1, 0, 2), N_REP, axis=0)
        s = jnp.einsum("hqd,hkd->hqk", qh.astype(jnp.bfloat16), kh.astype(jnp.bfloat16),
                       preferred_element_type=jnp.float32) / math.sqrt(HEAD_DIM) + mask[None]
        s = s - jnp.max(s, axis=-1, keepdims=True)
        e = jnp.exp(s)
        pm = e / jnp.sum(e, axis=-1, keepdims=True)
        o = jnp.einsum("hqk,hkd->hqd", pm.astype(jnp.bfloat16), vh.astype(jnp.bfloat16),
                       preferred_element_type=jnp.float32)
        o = o.transpose(1, 0, 2).reshape(T, -1)
        h = h + _bdot(o, p["wo"])
        xn2 = _rmsnorm(h, p["ffn_norm"], NORM_EPS)
        a = _bdot(xn2, p["w1"])
        h = h + _bdot((a * jax.nn.sigmoid(a)) * _bdot(xn2, p["w3"]), p["w2"])
    return _bdot(_rmsnorm(h, params["final_norm"], NORM_EPS), params["output"])


if __name__ == "__main__":
    key = jax.random.PRNGKey(0)
    k_ids, k_params = jax.random.split(key)

    seqlens = [5, 3]                        # two packed sequences, T = 8
    T = sum(seqlens)
    input_ids = jax.random.randint(k_ids, (T,), 0, VOCAB)
    params = init_params(k_params)
    positions = jnp.concatenate([jnp.arange(s) for s in seqlens])   # SimpleInputMetadata
    packed = pack_params(params, positions, seqlens)

    logits = mistral_forward(input_ids, seqlens, params, packed)
    logits = jax.block_until_ready(logits)
    assert logits.shape == (T, VOCAB) and logits.dtype == jnp.float32

    ref = reference_forward(input_ids, params, positions, packed["mask"])
    # Tolerance covers the bf16-fed MXU (mirrored in the reference), the approximate
    # softmax reciprocal and the scale/gamma folding into the packed weights.
    max_err = float(jnp.max(jnp.abs(logits - ref)))
    assert jnp.allclose(logits, ref, atol=2e-2, rtol=2e-2), max_err

    print("KERNEL_OK")
</pallas_src>

<mosaic_0001>
module attributes {stable_mosaic.version = 11 : i64} {
  func.func @mistral_layers_kernel(%arg0: i32, %arg1: memref<8x32xf32, #tpu.memory_space<vmem>>, %arg2: memref<8x32xf32, #tpu.memory_space<vmem>>, %arg3: memref<8x32xf32, #tpu.memory_space<vmem>>, %arg4: memref<8x8xf32, #tpu.memory_space<vmem>>, %arg5: memref<1x4x32x64xbf16, #tpu.memory_space<vmem>>, %arg6: memref<1x4x8x32xbf16, #tpu.memory_space<vmem>>, %arg7: memref<1x32x128xbf16, #tpu.memory_space<vmem>>, %arg8: memref<1x64x32xbf16, #tpu.memory_space<vmem>>, %arg9: memref<32x128xbf16, #tpu.memory_space<vmem>>, %arg10: memref<8x128xf32, #tpu.memory_space<vmem>>, %arg11: memref<8x32xf32, #tpu.memory_space<vmem>>) attributes {dimension_semantics = [#tpu.dimension_semantics<arbitrary>], iteration_bounds = array<i64: 2>, scalar_prefetch = 0 : i64, scratch_operands = 1 : i64, tpu.core_type = #tpu.core_type<tc>, window_params = [{pipeline_mode = #tpu.pipeline_mode<synchronous>, transform_indices = @transform_0, window_bounds = array<i64: 8, 32>}, {pipeline_mode = #tpu.pipeline_mode<synchronous>, transform_indices = @transform_1, window_bounds = array<i64: 8, 32>}, {pipeline_mode = #tpu.pipeline_mode<synchronous>, transform_indices = @transform_2, window_bounds = array<i64: 8, 32>}, {pipeline_mode = #tpu.pipeline_mode<synchronous>, transform_indices = @transform_3, window_bounds = array<i64: 8, 8>}, {transform_indices = @transform_4, window_bounds = array<i64: 1, 4, 32, 64>}, {transform_indices = @transform_5, window_bounds = array<i64: 1, 4, 8, 32>}, {transform_indices = @transform_6, window_bounds = array<i64: 1, 32, 128>}, {transform_indices = @transform_7, window_bounds = array<i64: 1, 64, 32>}, {pipeline_mode = #tpu.pipeline_mode<synchronous>, transform_indices = @transform_8, window_bounds = array<i64: 32, 128>}, {pipeline_mode = #tpu.pipeline_mode<synchronous>, transform_indices = @transform_9, window_bounds = array<i64: 8, 128>}]} {
    %c0_i32 = arith.constant 0 : i32
    %0 = arith.cmpi eq, %arg0, %c0_i32 : i32
    %1 = arith.extui %0 : i1 to i32
    %c0_i32_0 = arith.constant 0 : i32
    %2 = arith.cmpi ne, %1, %c0_i32_0 : i32
    scf.if %2 {
      %c0_40 = arith.constant 0 : index
      %c0_41 = arith.constant 0 : index
      %92 = vector.load %arg1[%c0_40, %c0_41] : memref<8x32xf32, #tpu.memory_space<vmem>>, vector<8x32xf32>
      %c0_42 = arith.constant 0 : index
      %c0_43 = arith.constant 0 : index
      %93 = vector.load %arg11[%c0_42, %c0_43] : memref<8x32xf32, #tpu.memory_space<vmem>>, vector<8x32xf32>
      tpu.vector_store %arg11[%c0_42, %c0_43], %92 {strides = array<i32>} : memref<8x32xf32, #tpu.memory_space<vmem>>, vector<8x32xf32>,
    } else {
    }
    %c0 = arith.constant 0 : index
    %c0_1 = arith.constant 0 : index
    %3 = vector.load %arg11[%c0, %c0_1] : memref<8x32xf32, #tpu.memory_space<vmem>>, vector<8x32xf32>
    %c0_2 = arith.constant 0 : index
    %c0_3 = arith.constant 0 : index
    %4 = vector.load %arg2[%c0_2, %c0_3] : memref<8x32xf32, #tpu.memory_space<vmem>>, vector<8x32xf32>
    %c0_4 = arith.constant 0 : index
    %c0_5 = arith.constant 0 : index
    %5 = vector.load %arg3[%c0_4, %c0_5] : memref<8x32xf32, #tpu.memory_space<vmem>>, vector<8x32xf32>
    %6 = arith.mulf %3, %3 : vector<8x32xf32>
    %cst = arith.constant dense<0.000000e+00> : vector<8xf32>
    %7 = vector.multi_reduction <add>, %6, %cst [1] : vector<8x32xf32> to vector<8xf32>
    %8 = vector.shape_cast %7 : vector<8xf32> to vector<8x1xf32>
    %cst_6 = arith.constant 3.200000e+01 : f32
    %9 = vector.broadcast %cst_6 : f32 to vector<8x1xf32>
    %10 = arith.divf %8, %9 : vector<8x1xf32>
    %cst_7 = arith.constant 9.99999974E-6 : f32
    %11 = vector.broadcast %cst_7 : f32 to vector<8x1xf32>
    %12 = arith.addf %10, %11 : vector<8x1xf32>
    %13 = math.rsqrt %12 : vector<8x1xf32>
    %14 = vector.broadcast %13 : vector<8x1xf32> to vector<8x32xf32>
    %15 = arith.mulf %3, %14 : vector<8x32xf32>
    %16 = arith.truncf %15 : vector<8x32xf32> to vector<8x32xbf16>
    %17 = vector.shape_cast %16 : vector<8x32xbf16> to vector<1x8x32xbf16>
    %18 = vector.broadcast %17 : vector<1x8x32xbf16> to vector<4x8x32xbf16>
    %c0_8 = arith.constant 0 : index
    %c0_9 = arith.constant 0 : index
    %c0_10 = arith.constant 0 : index
    %c0_11 = arith.constant 0 : index
    %19 = vector.load %arg5[%c0_8, %c0_9, %c0_10, %c0_11] : memref<1x4x32x64xbf16, #tpu.memory_space<vmem>>, vector<1x4x32x64xbf16>
    %20 = vector.shape_cast %19 : vector<1x4x32x64xbf16> to vector<4x32x64xbf16>
    "tpu.trace_start"() <{level = 10 : i32, message = "htd,hdw->htw"}> : () -> ()
    %cst_12 = arith.constant dense<0.000000e+00> : vector<4x8x64xf32>
    %21 = tpu.matmul %18, %20, %cst_12 {dimension_numbers = #tpu.dot_dimension_numbers<[2], [1], [1], [2], [0, 0, 0, 1, 1, 2], [0], [0]>} : vector<4x8x32xbf16>, vector<4x32x64xbf16>, vector<4x8x64xf32> -> vector<4x8x64xf32>
    "tpu.trace_stop"() : () -> ()
    %22 = vector.extract_strided_slice %21 {offsets = [0, 0, 0], sizes = [4, 8, 32], strides = [1, 1, 1]} : vector<4x8x64xf32> to vector<4x8x32xf32>
    %23 = vector.shape_cast %4 : vector<8x32xf32> to vector<1x8x32xf32>
    %24 = vector.broadcast %23 : vector<1x8x32xf32> to vector<4x8x32xf32>
    %25 = arith.mulf %22, %24 : vector<4x8x32xf32>
    %26 = vector.extract_strided_slice %21 {offsets = [0, 0, 32], sizes = [4, 8, 32], strides = [1, 1, 1]} : vector<4x8x64xf32> to vector<4x8x32xf32>
    %27 = vector.shape_cast %5 : vector<8x32xf32> to vector<1x8x32xf32>
    %28 = vector.broadcast %27 : vector<1x8x32xf32> to vector<4x8x32xf32>
    %29 = arith.mulf %26, %28 : vector<4x8x32xf32>
    %30 = arith.addf %25, %29 : vector<4x8x32xf32>
    %31 = vector.extract_strided_slice %30 {offsets = [0, 0, 0], sizes = [4, 8, 8], strides = [1, 1, 1]} : vector<4x8x32xf32> to vector<4x8x8xf32>
    %32 = arith.truncf %31 : vector<4x8x8xf32> to vector<4x8x8xbf16>
    %33 = vector.extract_strided_slice %30 {offsets = [0, 0, 8], sizes = [4, 8, 8], strides = [1, 1, 1]} : vector<4x8x32xf32> to vector<4x8x8xf32>
    %34 = arith.truncf %33 : vector<4x8x8xf32> to vector<4x8x8xbf16>
    %35 = vector.extract_strided_slice %30 {offsets = [0, 0, 16], sizes = [4, 8, 8], strides = [1, 1, 1]} : vector<4x8x32xf32> to vector<4x8x8xf32>
    %36 = arith.truncf %35 : vector<4x8x8xf32> to vector<4x8x8xbf16>
    "tpu.trace_start"() <{level = 10 : i32, message = "hqd,hkd->hqk"}> : () -> ()
    %cst_13 = arith.constant dense<0.000000e+00> : vector<4x8x8xf32>
    %37 = tpu.matmul %32, %34, %cst_13 {dimension_numbers = #tpu.dot_dimension_numbers<[2], [2], [1], [1], [0, 0, 0, 1, 1, 1], [0], [0]>} : vector<4x8x8xbf16>, vector<4x8x8xbf16>, vector<4x8x8xf32> -> vector<4x8x8xf32>
    "tpu.trace_stop"() : () -> ()
    %c0_14 = arith.constant 0 : index
    %c0_15 = arith.constant 0 : index
    %38 = vector.load %arg4[%c0_14, %c0_15] : memref<8x8xf32, #tpu.memory_space<vmem>>, vector<8x8xf32>
    %39 = vector.shape_cast %38 : vector<8x8xf32> to vector<1x8x8xf32>
    %40 = vector.broadcast %39 : vector<1x8x8xf32> to vector<4x8x8xf32>
    %41 = arith.addf %37, %40 : vector<4x8x8xf32>
    %cst_16 = arith.constant dense<0xFF800000> : vector<4x8xf32>
    %42 = vector.multi_reduction <maximumf>, %41, %cst_16 [2] : vector<4x8x8xf32> to vector<4x8xf32>
    %43 = vector.shape_cast %42 : vector<4x8xf32> to vector<4x8x1xf32>
    %44 = vector.broadcast %43 : vector<4x8x1xf32> to vector<4x8x8xf32>
    %45 = arith.subf %41, %44 : vector<4x8x8xf32>
    %46 = math.exp %45 : vector<4x8x8xf32>
    %cst_17 = arith.constant dense<0.000000e+00> : vector<4x8xf32>
    %47 = vector.multi_reduction <add>, %46, %cst_17 [2] : vector<4x8x8xf32> to vector<4x8xf32>
    %48 = vector.shape_cast %47 : vector<4x8xf32> to vector<4x8x1xf32>
    %49 = tpu.reciprocal %48 {approx = true} : vector<4x8x1xf32> -> vector<4x8x1xf32>
    %50 = vector.broadcast %49 : vector<4x8x1xf32> to vector<4x8x8xf32>
    %51 = arith.mulf %46, %50 : vector<4x8x8xf32>
    %52 = arith.truncf %51 : vector<4x8x8xf32> to vector<4x8x8xbf16>
    "tpu.trace_start"() <{level = 10 : i32, message = "hqk,hkd->hqd"}> : () -> ()
    %cst_18 = arith.constant dense<0.000000e+00> : vector<4x8x8xf32>
    %53 = tpu.matmul %52, %36, %cst_18 {dimension_numbers = #tpu.dot_dimension_numbers<[2], [1], [1], [2], [0, 0, 0, 1, 1, 2], [0], [0]>} : vector<4x8x8xbf16>, vector<4x8x8xbf16>, vector<4x8x8xf32> -> vector<4x8x8xf32>
    "tpu.trace_stop"() : () -> ()
    %54 = arith.truncf %53 : vector<4x8x8xf32> to vector<4x8x8xbf16>
    %c0_19 = arith.constant 0 : index
    %c0_20 = arith.constant 0 : index
    %c0_21 = arith.constant 0 : index
    %c0_22 = arith.constant 0 : index
    %55 = vector.load %arg6[%c0_19, %c0_20, %c0_21, %c0_22] : memref<1x4x8x32xbf16, #tpu.memory_space<vmem>>, vector<1x4x8x32xbf16>
    %56 = vector.shape_cast %55 : vector<1x4x8x32xbf16> to vector<4x8x32xbf16>
    "tpu.trace_start"() <{level = 10 : i32, message = "hqd,hdm->hqm"}> : () -> ()
    %cst_23 = arith.constant dense<0.000000e+00> : vector<4x8x32xf32>
    %57 = tpu.matmul %54, %56, %cst_23 {dimension_numbers = #tpu.dot_dimension_numbers<[2], [1], [1], [2], [0, 0, 0, 1, 1, 2], [0], [0]>} : vector<4x8x8xbf16>, vector<4x8x32xbf16>, vector<4x8x32xf32> -> vector<4x8x32xf32>
    "tpu.trace_stop"() : () -> ()
    %cst_24 = arith.constant dense<0.000000e+00> : vector<8x32xf32>
    %58 = vector.multi_reduction <add>, %57, %cst_24 [0] : vector<4x8x32xf32> to vector<8x32xf32>
    %59 = arith.addf %3, %58 : vector<8x32xf32>
    %60 = arith.mulf %59, %59 : vector<8x32xf32>
    %cst_25 = arith.constant dense<0.000000e+00> : vector<8xf32>
    %61 = vector.multi_reduction <add>, %60, %cst_25 [1] : vector<8x32xf32> to vector<8xf32>
    %62 = vector.shape_cast %61 : vector<8xf32> to vector<8x1xf32>
    %cst_26 = arith.constant 3.200000e+01 : f32
    %63 = vector.broadcast %cst_26 : f32 to vector<8x1xf32>
    %64 = arith.divf %62, %63 : vector<8x1xf32>
    %cst_27 = arith.constant 9.99999974E-6 : f32
    %65 = vector.broadcast %cst_27 : f32 to vector<8x1xf32>
    %66 = arith.addf %64, %65 : vector<8x1xf32>
    %67 = math.rsqrt %66 : vector<8x1xf32>
    %68 = vector.broadcast %67 : vector<8x1xf32> to vector<8x32xf32>
    %69 = arith.mulf %59, %68 : vector<8x32xf32>
    %70 = arith.truncf %69 : vector<8x32xf32> to vector<8x32xbf16>
    %c0_28 = arith.constant 0 : index
    %c0_29 = arith.constant 0 : index
    %c0_30 = arith.constant 0 : index
    %71 = vector.load %arg7[%c0_28, %c0_29, %c0_30] : memref<1x32x128xbf16, #tpu.memory_space<vmem>>, vector<1x32x128xbf16>
    %72 = vector.shape_cast %71 : vector<1x32x128xbf16> to vector<32x128xbf16>
    %cst_31 = arith.constant dense<0.000000e+00> : vector<8x128xf32>
    %73 = tpu.matmul %70, %72, %cst_31 {dimension_numbers = #tpu.dot_dimension_numbers<[1], [0], [0], [1], [0, 0, 1, 1], [], []>} : vector<8x32xbf16>, vector<32x128xbf16>, vector<8x128xf32> -> vector<8x128xf32>
    %74 = vector.extract_strided_slice %73 {offsets = [0, 0], sizes = [8, 64], strides = [1, 1]} : vector<8x128xf32> to vector<8x64xf32>
    %75 = vector.extract_strided_slice %73 {offsets = [0, 64], sizes = [8, 64], strides = [1, 1]} : vector<8x128xf32> to vector<8x64xf32>
    %76 = arith.negf %74 : vector<8x64xf32>
    %77 = math.exp %76 : vector<8x64xf32>
    %cst_32 = arith.constant 1.000000e+00 : f32
    %78 = vector.broadcast %cst_32 : f32 to vector<8x64xf32>
    %79 = arith.addf %78, %77 : vector<8x64xf32>
    %80 = arith.divf %78, %79 : vector<8x64xf32>
    %81 = arith.mulf %74, %80 : vector<8x64xf32>
    %82 = arith.mulf %81, %75 : vector<8x64xf32>
    %83 = arith.truncf %82 : vector<8x64xf32> to vector<8x64xbf16>
    %c0_33 = arith.constant 0 : index
    %c0_34 = arith.constant 0 : index
    %c0_35 = arith.constant 0 : index
    %84 = vector.load %arg8[%c0_33, %c0_34, %c0_35] : memref<1x64x32xbf16, #tpu.memory_space<vmem>>, vector<1x64x32xbf16>
    %85 = vector.shape_cast %84 : vector<1x64x32xbf16> to vector<64x32xbf16>
    %cst_36 = arith.constant dense<0.000000e+00> : vector<8x32xf32>
    %86 = tpu.matmul %83, %85, %cst_36 {dimension_numbers = #tpu.dot_dimension_numbers<[1], [0], [0], [1], [0, 0, 1, 1], [], []>} : vector<8x64xbf16>, vector<64x32xbf16>, vector<8x32xf32> -> vector<8x32xf32>
    %87 = arith.addf %59, %86 : vector<8x32xf32>
    %c0_37 = arith.constant 0 : index
    %c0_38 = arith.constant 0 : index
    %88 = vector.load %arg11[%c0_37, %c0_38] : memref<8x32xf32, #tpu.memory_space<vmem>>, vector<8x32xf32>
    tpu.vector_store %arg11[%c0_37, %c0_38], %87 {strides = array<i32>} : memref<8x32xf32, #tpu.memory_space<vmem>>, vector<8x32xf32>,
    %c1_i32 = arith.constant 1 : i32
    %89 = arith.cmpi eq, %arg0, %c1_i32 : i32
    %90 = arith.extui %89 : i1 to i32
    %c0_i32_39 = arith.constant 0 : i32
    %91 = arith.cmpi ne, %90, %c0_i32_39 : i32
    scf.if %91 {
      %92 = arith.mulf %87, %87 : vector<8x32xf32>
      %cst_40 = arith.constant dense<0.000000e+00> : vector<8xf32>
      %93 = vector.multi_reduction <add>, %92, %cst_40 [1] : vector<8x32xf32> to vector<8xf32>
      %94 = vector.shape_cast %93 : vector<8xf32> to vector<8x1xf32>
      %cst_41 = arith.constant 3.200000e+01 : f32
      %95 = vector.broadcast %cst_41 : f32 to vector<8x1xf32>
      %96 = arith.divf %94, %95 : vector<8x1xf32>
      %cst_42 = arith.constant 9.99999974E-6 : f32
      %97 = vector.broadcast %cst_42 : f32 to vector<8x1xf32>
      %98 = arith.addf %96, %97 : vector<8x1xf32>
      %99 = math.rsqrt %98 : vector<8x1xf32>
      %100 = vector.broadcast %99 : vector<8x1xf32> to vector<8x32xf32>
      %101 = arith.mulf %87, %100 : vector<8x32xf32>
      %102 = arith.truncf %101 : vector<8x32xf32> to vector<8x32xbf16>
      %c0_43 = arith.constant 0 : index
      %c0_44 = arith.constant 0 : index
      %103 = vector.load %arg9[%c0_43, %c0_44] : memref<32x128xbf16, #tpu.memory_space<vmem>>, vector<32x128xbf16>
      %cst_45 = arith.constant dense<0.000000e+00> : vector<8x128xf32>
      %104 = tpu.matmul %102, %103, %cst_45 {dimension_numbers = #tpu.dot_dimension_numbers<[1], [0], [0], [1], [0, 0, 1, 1], [], []>} : vector<8x32xbf16>, vector<32x128xbf16>, vector<8x128xf32> -> vector<8x128xf32>
      %c0_46 = arith.constant 0 : index
      %c0_47 = arith.constant 0 : index
      %105 = vector.load %arg10[%c0_46, %c0_47] : memref<8x128xf32, #tpu.memory_space<vmem>>, vector<8x128xf32>
      tpu.vector_store %arg10[%c0_46, %c0_47], %104 {strides = array<i32>} : memref<8x128xf32, #tpu.memory_space<vmem>>, vector<8x128xf32>,
    } else {
    }
    return
  }
  func.func @transform_0(%arg0: i32) -> (i32, i32) {
    %c0_i32 = arith.constant 0 : i32
    %c0_i32_0 = arith.constant 0 : i32
    %c0_i32_1 = arith.constant 0 : i32
    return %c0_i32, %c0_i32_0 : i32, i32
  }
  func.func @transform_1(%arg0: i32) -> (i32, i32) {
    %c0_i32 = arith.constant 0 : i32
    %c0_i32_0 = arith.constant 0 : i32
    %c0_i32_1 = arith.constant 0 : i32
    return %c0_i32, %c0_i32_0 : i32, i32
  }
  func.func @transform_2(%arg0: i32) -> (i32, i32) {
    %c0_i32 = arith.constant 0 : i32
    %c0_i32_0 = arith.constant 0 : i32
    %c0_i32_1 = arith.constant 0 : i32
    return %c0_i32, %c0_i32_0 : i32, i32
  }
  func.func @transform_3(%arg0: i32) -> (i32, i32) {
    %c0_i32 = arith.constant 0 : i32
    %c0_i32_0 = arith.constant 0 : i32
    %c0_i32_1 = arith.constant 0 : i32
    return %c0_i32, %c0_i32_0 : i32, i32
  }
  func.func @transform_4(%arg0: i32) -> (i32, i32, i32, i32) {
    %c0_i32 = arith.constant 0 : i32
    %c0_i32_0 = arith.constant 0 : i32
    %c0_i32_1 = arith.constant 0 : i32
    %c0_i32_2 = arith.constant 0 : i32
    return %arg0, %c0_i32, %c0_i32_0, %c0_i32_1 : i32, i32, i32, i32
  }
  func.func @transform_5(%arg0: i32) -> (i32, i32, i32, i32) {
    %c0_i32 = arith.constant 0 : i32
    %c0_i32_0 = arith.constant 0 : i32
    %c0_i32_1 = arith.constant 0 : i32
    %c0_i32_2 = arith.constant 0 : i32
    return %arg0, %c0_i32, %c0_i32_0, %c0_i32_1 : i32, i32, i32, i32
  }
  func.func @transform_6(%arg0: i32) -> (i32, i32, i32) {
    %c0_i32 = arith.constant 0 : i32
    %c0_i32_0 = arith.constant 0 : i32
    %c0_i32_1 = arith.constant 0 : i32
    return %arg0, %c0_i32, %c0_i32_0 : i32, i32, i32
  }
  func.func @transform_7(%arg0: i32) -> (i32, i32, i32) {
    %c0_i32 = arith.constant 0 : i32
    %c0_i32_0 = arith.constant 0 : i32
    %c0_i32_1 = arith.constant 0 : i32
    return %arg0, %c0_i32, %c0_i32_0 : i32, i32, i32
  }
  func.func @transform_8(%arg0: i32) -> (i32, i32) {
    %c0_i32 = arith.constant 0 : i32
    %c0_i32_0 = arith.constant 0 : i32
    %c0_i32_1 = arith.constant 0 : i32
    return %c0_i32, %c0_i32_0 : i32, i32
  }
  func.func @transform_9(%arg0: i32) -> (i32, i32) {
    %c0_i32 = arith.constant 0 : i32
    %c0_i32_0 = arith.constant 0 : i32
    %c0_i32_1 = arith.constant 0 : i32
    return %c0_i32, %c0_i32_0 : i32, i32
  }
}

</mosaic_0001>

<bundles_post_ra>
// kernel: tpu_custom_call.1
= control target key start
LH: loop header
LB: loop body
LE: loop exit
PB: predicated region body
PF: predicated region fallthrough
CT: control target
= control target key end

     0   :  { %14 = vsyncpa [#allocation4], 0  ;;  %s2617_s0 = inlined_call_operand.vmem [shape: f32[8,32], index: 0, kind: input, shape index: {}]   ;;  %s2618_s1 = inlined_call_operand.vmem [shape: f32[8,32], index: 1, kind: input, shape index: {}]   ;;  %s2619_s2 = inlined_call_operand.hbm [shape: f32[8,32], index: 2, kind: input, shape index: {}]   ;;  %s2620_s3 = inlined_call_operand.hbm [shape: f32[8,8], index: 3, kind: input, shape index: {}]   ;;  %s2621_s4 = inlined_call_operand.hbm [shape: bf16[2,4,32,64], index: 4, kind: input, shape index: {}]   ;;  %s2622_s5 = inlined_call_operand.vmem [shape: bf16[2,4,8,32], index: 5, kind: input, shape index: {}]   ;;  %s2623_s6 = inlined_call_operand.vmem [shape: bf16[2,32,128], index: 6, kind: input, shape index: {}]   ;;  %s2624_s7 = inlined_call_operand.vmem [shape: bf16[2,64,32], index: 7, kind: input, shape index: {}]   ;;  %s2625_s8 = inlined_call_operand.vmem [shape: bf16[32,128], index: 8, kind: input, shape index: {}]   ;;  %s2626_s9 = inlined_call_operand.hbm [shape: f32[8,128], index: 9, kind: output, shape index: {}]  }
   0x1   :  { %15 = vsyncpa [#allocation7], 0 }
   0x2   :  { %16 = vsyncpa [#allocation5], 0  ;;  %s2270_s30 = smov 0   ;;  %s2272_s10 = smov 0  }
   0x3   :  { %s2274_s11 = smov 0   ;;  %s2276_s12 = smov 0  }
   0x4 LB: > { %s2289_s13 = sadd.s32 4294967295, %s2203_s12   ;;  %s2292_s14 = sadd.s32 1, %s2203_s12   ;;  %s2203_s12 = sphi %s2276_s12, %s2647_s12   ;;  %s2199_s11 = sphi %s2274_s11, %s2646_s11   ;;  %s2195_s10 = sphi %s2272_s10, %s2645_s10   ;;  %s2191_s30 = sphi %s2270_s30, %s2644_s30  }
   0x5   : > { %s110_s15 = ssub.s32 %s2203_s12, %s2292_s14  ;;  %s113_s16 = sadd.s32 1, %s2199_s11 }
   0x6   : > { %p111_p0 = scmp.eq.s32.totalorder %s110_s15, 0  ;;  %p120_p1 = scmp.ne.s32.totalorder %s2199_s11, %s2195_s10 }
   0x7   : > { %p121_p2 = scmp.eq.s32.totalorder %s2203_s12, 0  ;;  %p126_p3 = scmp.ne.s32.totalorder %s2195_s10, %s2191_s30 }
   0x8   : > { %s2302_s17 = scalar_select %p111_p0, %s2199_s11, %s113_s16  }
   0x9   : > { %p2304_p4 = por %p121_p2, %p120_p1  ;;  %p2627_p5 = scmp.eq.s32.totalorder %s2289_s13, 0 }
   0xa   : > { %p1691_p6 = scmp.ge.s32.totalorder %s2203_s12, 1  ;;  %p257_p7 = scmp.lt.s32.totalorder %s2203_s12, 3 }
   0xb   : > { %p2313_p8 = por %p2627_p5, %p126_p3  ;;  %s2205_s21 = smov [#allocation3]  }
   0xc   : > { %p2318_p10 = pnand %p1691_p6, %p257_p7  ;;  %s276_s22 = sshll.u32 %s2205_s21, 4  ;;  %s277_s22 = int_to_ptr.vmem [resolvable:$true] %s276_s22 }
   0xd   : > { %s2632_s19 = scalar_select %p2313_p8, 1, 0 }
   0xe   : > { %s2633_s20 = scalar_select %p2318_p10, 1, 0 }
   0xf   : > { %p1947_p11 = pneg %p2318_p10  ;;  %p1960_p12 = scmp.lt.s32.totalorder %s2203_s12, 2 }
  0x10   : > { %s2206_s24 = smov [#allocation6]   ;;  %s301_s27 = sand.u32 1, %s2203_s12  }
  0x11   : > { %p2327_p13 = pnand %p1947_p11, %p2627_p5  ;;  %s287_s25 = sshll.u32 %s2206_s24, 4  ;;  %s288_s25 = int_to_ptr.vmem [resolvable:$true] %s287_s25 }
  0x12   : > { %p2333_p0 = pnand %p1960_p12, %p2304_p4  ;;  %s2064_s28 = scalar_lea.vmem %s277_s22, 128 }
  0x13   : > { %p2055_p1 = pneg %p2327_p13  ;;  %p2065_p2 = scmp.ne.s32.totalorder %s277_s22, %s2064_s28 }
  0x14   : > { %s2635_s26 = scalar_select %p2333_p0, 1, 0 }
  0x15   : > { %p2067_p3 = pnand %p2065_p2, %p2055_p1  ;;  %p2072_p7 = scmp.lt.s32.totalorder %s277_s22, %s277_s22 }
  0x16   : > { %p2073_p11 = scmp.lt.s32.totalorder %s2064_s28, %s2064_s28 }
  0x17   : > { %p2068_p6 = pneg %p2067_p3 }
  0x18   : > { %p2074_p9 = por %p2073_p11, %p2072_p7 }
  0x1a   : > { %p2075_p5 = pnand %p2074_p9, %p2068_p6 }
  0x1c   : > { %2078 = shalt.err (!%p2075_p5)
}
  0x1d   : > { %1950 = dma.hbm_to_vmem [thread:$0]  (!%p2327_p13), %s2619_s2, 128, %s277_s22, [#allocation4]  }
  0x1e   : > { %s2090_s15 = scalar_lea.vmem %s288_s25, 128  ;;  %p2098_p2 = scmp.lt.s32.totalorder %s288_s25, %s288_s25 }
  0x1f   : > { %p2091_p4 = scmp.ne.s32.totalorder %s288_s25, %s2090_s15  ;;  %p2099_p3 = scmp.lt.s32.totalorder %s2090_s15, %s2090_s15 }
  0x21   : > { %p2093_p12 = pnand %p2091_p4, %p2055_p1  ;;  %p2100_p10 = por %p2099_p3, %p2098_p2 }
  0x23   : > { %p2094_p8 = pneg %p2093_p12 }
  0x25   : > { %p2101_p0 = pnand %p2100_p10, %p2094_p8 }
  0x27   : > { %2104 = shalt.err (!%p2101_p0)
}
  0x28   : > { %1953 = dma.hbm_to_vmem [thread:$0]  (!%p2327_p13), %s2620_s3, 128, %s288_s25, [#allocation7]  }
  0x29   : > { %s303_s21 = sand.u32 1, %s2199_s11   ;;  %s1750_s22 = sshll.u32 %s2203_s12, 10 }
  0x2a   : > { %s1695_s24 = sshll.u32 %s303_s21, 6  ;;  %s2361_s30 = scalar_lea.hbm %s2621_s4, %s1750_s22 }
  0x2b   : > { %s305_s15 = scalar_lea.vmem [#allocation8], %s1695_s24  ;;  %s2365_s16 = scalar_lea.sflag [#allocation4], %s301_s27 }
  0x2c   : > { %s312_s23 = sshll.u32 %s305_s15, 4  ;;  %s2105_s18 = scalar_lea.hbm %s2361_s30, 1024  ;;  %s2363_s23 = int_to_ptr.vmem [resolvable:$true] %s312_s23 }
  0x2d   : > { %p2106_p5 = scmp.ne.s32.totalorder %s2361_s30, %s2105_s18  ;;  %p2636_p8 = scmp.ne.s32.totalorder %s2635_s26, 0 }
  0x2e   : > { %s2110_s21 = scalar_lea.hbm %s2621_s4, 2048  ;;  %p2111_p0 = scmp.lt.s32.totalorder %s2361_s30, %s2621_s4 }
  0x2f   : > { %p2107_p9 = pneg %p2636_p8  ;;  %p2112_p1 = scmp.lt.s32.totalorder %s2110_s21, %s2105_s18 }
  0x31   : > { %p2108_p10 = pnand %p2107_p9, %p2106_p5  ;;  %p2113_p6 = por %p2112_p1, %p2111_p0 }
  0x33   : > { %p2109_p13 = pneg %p2108_p10 }
  0x35   : > { %p2114_p7 = pnand %p2113_p6, %p2109_p13 }
  0x37   : > { %2117 = shalt.err (!%p2114_p7)
}
  0x38   : > { %s2118_s27 = scalar_lea.vmem %s2363_s23, 1024  ;;  %s2207_s24 = smov [#allocation8]  }
  0x39   : > { %p2119_p11 = scmp.ne.s32.totalorder %s2363_s23, %s2118_s27  ;;  %s2123_s29 = sshll.u32 %s2207_s24, 4  ;;  %s2124_s29 = int_to_ptr.vmem [resolvable:$false] %s2123_s29 }
  0x3a   : > { %s2125_s15 = scalar_lea.vmem %s2124_s29, 2048  ;;  %p2126_p2 = scmp.lt.s32.totalorder %s2363_s23, %s2124_s29 }
  0x3b   : > { %p2121_p4 = pnand %p2119_p11, %p2107_p9  ;;  %p2127_p3 = scmp.lt.s32.totalorder %s2125_s15, %s2118_s27 }
  0x3d   : > { %p2122_p12 = pneg %p2121_p4  ;;  %p2128_p5 = por %p2127_p3, %p2126_p2 }
  0x3f   : > { %p2129_p10 = pnand %p2128_p5, %p2122_p12 }
  0x41   : > { %2132 = shalt.err (!%p2129_p10)
}
  0x42   : > { %s2208_s18 = smov 64   ;;  %s2209_s12 = smov 4  }
  0x43   : > { %1957 = dma.hbm_to_vmem [thread:$0]  (!%p2636_p8), %s2361_s30, 1024, %s2363_s23, %s2365_s16, %s2208_s18, %s2208_s18, %s2209_s12  }
  0x44   : > { %p2637_p9 = scmp.ne.s32.totalorder %s2633_s20, 0 }
  0x45   : > { %p2638_p13 = scmp.eq.s32.totalorder (!%p2637_p9), %s2289_s13, 0 }
  0x46   : > { %348 = sbr.rel (%p2637_p9) target bundleno = 2710 (0xa96), region = 56 }
  0x4b   : > { %2174 = dma.done.wait (%p2638_p13), [#allocation4], 128   ;;  %p2639_p0 = pmov %p2638_p13 }
  0x4d   : > { %2176 = vsyncadd (%p2639_p0), [#allocation4], 4294967168  ;;  %p2640_p1 = pmov %p2639_p0 }
  0x4e   : > { %p2641_p6 = pmov %p2639_p0 }
  0x4f   : > { %2178 = dma.done.wait (%p2640_p1), [#allocation7], 128  }
  0x50   : > { %2180 = vsyncadd (%p2641_p6), [#allocation7], 4294967168  ;;  %s358_s26 = sand.u32 1, %s2289_s13   ;;  %s360_s30 = sand.u32 1, %s2195_s10  }
  0x51   : > { %s1701_s23 = sshll.u32 %s360_s30, 6  ;;  %s359_s20 = scalar_lea.sflag [#allocation4], %s358_s26 }
  0x52   : > { %s2398_s16 = scalar_lea.vmem [#allocation8], %s1701_s23  ;;  %p2642_p8 = scmp.ne.s32.totalorder %s2632_s19, 0 }
  0x54   : > { %2182 = dma.done.wait (%p2642_p8), %s359_s20, 1024  }
  0x55   : > { %2184 = vsyncadd (%p2642_p8), %s359_s20, 4294966272  ;;  %p407_p7 = scmp.lt.s32.totalorder %s2289_s13, 1  ;;  %p2643_p11 = scmp.ne.s32.totalorder %s2289_s13, 0 }
  0x57   : > { %s408_s25 = scalar_select %p407_p7, %s2289_s13, 1 }
  0x58   : > { %426 = sbr.rel (%p2643_p11) target bundleno = 95 (0x5f), region = 72 }
  0x59   : > { %s1751_s21 = sshll.u32 %s408_s25, 4  ;;  %s1753_s22 = sshll.u32 %s408_s25, 5 }
  0x5a   : > { %s2409_s24 = scalar_lea.vmem %s2622_s5, %s1751_s21  ;;  %s2414_s18 = scalar_lea.vmem %s2623_s6, %s1751_s21 }
  0x5b   : > { %s2419_s19 = scalar_lea.vmem %s2624_s7, %s1753_s22 }
  0x5d   : > { %v427_v0 = vld [vmem:[%s2617_s0] sm:$0xff]  ;;  %vm428_vm0 = vcmask 261120  }
  0x5e   : > { %429 = vst.msk [vmem:[#allocation2] sm:$0xff] %vm428_vm0, %v427_v0 }
  0x5f PF: > { %vm434_vm1 = vcmask 261120   ;;  %v2011_v4 = vld [vmem:[%s2398_s16 + $0x8] sm:$0xff]   ;;  %v2012_v5 = vld [vmem:[%s2398_s16 + $0x18] sm:$0xff]   ;;  %v2210_v6 = vmov 0.0   ;;  %v2013_v7 = vld [vmem:[%s2398_s16] sm:$0xff]   ;;  %vm2211_vm2 = vmmov 0  }
  0x60   : > { %1801 = vmatprep.subr.bf16.mxu0 %v2210_v6  ;;  %1809 = vmatprep.subr.bf16.mxu1 %v2210_v6  ;;  %v2014_v8 = vld [vmem:[%s2398_s16 + $0x10] sm:$0xff]   ;;  %s2212_s20 = smov 32   ;;  %v2015_v15 = vld [vmem:[%s2398_s16 + $0x28] sm:$0xff]   ;;  %v2016_v16 = vld [vmem:[%s2398_s16 + $0x38] sm:$0xff]   ;;  %s2214_s22 = smov 120   ;;  %vm711_vm3 = vcmask 64512  }
  0x61   : > { %1802 = vmatpush3.bf16.msra.mxu0 %v2011_v4  ;;  %1810 = vmatpush3.bf16.msra.mxu1 %v2012_v5  ;;  %v432_v9 = vld [vmem:[#allocation3] sm:$0xff]  ;;  %v2017_v18 = vld [vmem:[%s2398_s16 + $0x20] sm:$0xff]   ;;  %v431_v41 = vld [vmem:[%s2618_s1] sm:$0xff]  ;;  %s2215_s28 = smov 112   ;;  %vm958_vm4 = vcmask 1043456   ;;  %s2216_s27 = smov 64  }
  0x62   : > { %1803 = vmatprep.subr.bf16.mxu0 %v2210_v6  ;;  %1811 = vmatprep.subr.bf16.mxu1 %v2210_v6  ;;  %v2018_v19 = vld [vmem:[%s2398_s16 + $0x30] sm:$0xff]   ;;  %s2213_s16 = smov 96   ;;  %vm1459_vm5 = vcmask 523264   ;;  %p1742_p4 = scmp.ne.s32.totalorder %s2289_s13, 1 }
  0x63   : > { %1805 = vmatprep.mubr.msk.bf16.mxu0 %vm2211_vm2, %v2210_v6  ;;  %1813 = vmatprep.mubr.msk.bf16.mxu1 %vm2211_vm2, %v2210_v6 }
  0x65   : > { %v2426_v1 = vld [vmem:[#allocation2] sm:$0xff]  ;;  %1804 = vmatpush3.bf16.msra.mxu0 %v2013_v7  ;;  %1812 = vmatpush3.bf16.msra.mxu1 %v2014_v8 }
  0x66   : > { %v433_v2 = vmul.f32 %v2426_v1, %v2426_v1  ;;  %1817 = vmatprep.subr.bf16.mxu0 %v2210_v6  ;;  %1825 = vmatprep.subr.bf16.mxu1 %v2210_v6 }
  0x68   : > { %v435_v3 = vsel %vm434_vm1, %v433_v2, 0.0 }
  0x69   : > { %436 = vadd.xlane.f32.xlu0 %v435_v3  ;;  %v707_v3 = vld [vmem:[#allocation6] sm:$0xff] }
  0x7f   : > { %676 = vrot.lane.b32.xlu0 %v432_v9, %s2212_s20 }
  0xf2   : > { %v437_v10 = vpop.xlane.xlu0 %436 }
  0xf3   : > { %v439_v11 = vmul.f32 0.03125, %v437_v10 }
  0xf5   : > { %v440_v12 = vadd.f32 1e-05, %v439_v11 }
  0xf6   : > { %v677_v20 = vpop.permute.xlu0 %676 }
  0xf7   : > { %2025 = vrsqrt.f32 %v440_v12 }
 0x104   : > { %v2026_v13 = vpop.eup %2025 }
 0x105   : > { %v442_v14 = vmul.f32 %v2026_v13, %v2426_v1 }
 0x107   : > { %v443_v17 = vpack.c.bf16 %v442_v14, %v442_v14 }
 0x109   : > { %1806 = vmatmul.mubr.msk.bf16.vlgmr.msra.gmra.mxu0 %vm434_vm1, %v443_v17  ;;  %1814 = vmatmul.mubr.msk.bf16.vlgmr.msra.gmra.mxu1 %vm434_vm1, %v443_v17 }
 0x10a   : > { %1818 = vmatpush3.bf16.msra.mxu0 %v2015_v15  ;;  %1826 = vmatpush3.bf16.msra.mxu1 %v2016_v16 }
 0x10b   : > { %1819 = vmatprep.subr.bf16.mxu0 %v2210_v6  ;;  %1827 = vmatprep.subr.bf16.mxu1 %v2210_v6 }
 0x10c   : > { %1821 = vmatprep.mubr.msk.bf16.mxu0 %vm2211_vm2, %v2210_v6  ;;  %1829 = vmatprep.mubr.msk.bf16.mxu1 %vm2211_vm2, %v2210_v6 }
 0x10e   : > { %1820 = vmatpush3.bf16.msra.mxu0 %v2017_v18  ;;  %1828 = vmatpush3.bf16.msra.mxu1 %v2018_v19 }
 0x10f   : > { %1833 = vmatprep.subr.bf16.mxu0 %v2210_v6  ;;  %1839 = vmatprep.subr.bf16.mxu1 %v2210_v6 }
 0x111   : > { %1822 = vmatmul.mubr.msk.bf16.vlgmr.msra.gmra.mxu0 %vm434_vm1, %v443_v17  ;;  %1830 = vmatmul.mubr.msk.bf16.vlgmr.msra.gmra.mxu1 %vm434_vm1, %v443_v17 }
 0x112   : > { %1835 = vmatprep.mubr.msk.bf16.mxu0 %vm2211_vm2, %v2210_v6  ;;  %1841 = vmatprep.mubr.msk.bf16.mxu1 %vm2211_vm2, %v2210_v6 }
 0x1c9   : > { %v509_v21 = vpop.f32.mrf.mxu0  ;;  %v561_v22 = vpop.f32.mrf.mxu1 }
 0x1ca   : > { %v679_v23 = vmul.f32 %v677_v20, %v509_v21  ;;  %v680_v28 = vmul.f32 %v677_v20, %v561_v22  ;;  %v671_v42 = vmul.f32 %v509_v21, %v431_v41  ;;  %v672_v45 = vmul.f32 %v561_v22, %v431_v41 }
 0x1cb   : > { %v1807_v24 = vpop.f32.mrf.mxu0  ;;  %v1815_v25 = vpop.f32.mrf.mxu1 }
 0x1cc   : > { %687 = vrot.lane.b32.xlu1 %v679_v23, %s2213_s16 }
 0x1cd   : > { %v512_v26 = vpop.f32.mrf.mxu0  ;;  %v564_v27 = vpop.f32.mrf.mxu1 }
 0x1cf   : > { %v1808_v29 = vpop.f32.mrf.mxu0  ;;  %v1816_v30 = vpop.f32.mrf.mxu1 }
 0x1d0   : > { %689 = vrot.lane.b32.xlu1 %v680_v28, %s2213_s16 }
 0x1d1   : > { %v613_v31 = vpop.f32.mrf.mxu0  ;;  %v665_v32 = vpop.f32.mrf.mxu1 }
 0x1d2   : > { %v681_v33 = vmul.f32 %v677_v20, %v613_v31  ;;  %v682_v38 = vmul.f32 %v677_v20, %v665_v32  ;;  %v673_v49 = vmul.f32 %v613_v31, %v431_v41  ;;  %v674_v53 = vmul.f32 %v665_v32, %v431_v41 }
 0x1d3   : > { %v1823_v34 = vpop.f32.mrf.mxu0  ;;  %v1831_v35 = vpop.f32.mrf.mxu1 }
 0x1d4   : > { %691 = vrot.lane.b32.xlu1 %v681_v33, %s2213_s16 }
 0x1d5   : > { %v616_v36 = vpop.f32.mrf.mxu0  ;;  %v668_v37 = vpop.f32.mrf.mxu1 }
 0x1d7   : > { %v1824_v39 = vpop.f32.mrf.mxu0  ;;  %v1832_v40 = vpop.f32.mrf.mxu1 }
 0x1d8   : > { %693 = vrot.lane.b32.xlu1 %v682_v38, %s2213_s16 }
 0x23e   : > { %v688_v43 = vpop.permute.xlu1 %687 }
 0x23f   : > { %v699_v44 = vadd.f32 %v688_v43, %v671_v42 }
 0x241   : > { %v2469_v46 = vpack.c.bf16 %v699_v44, %v699_v44 }
 0x242   : > { %v690_v47 = vpop.permute.xlu1 %689 }
 0x243   : > { %v700_v48 = vadd.f32 %v690_v47, %v672_v45  ;;  %709 = vrot.lane.b32.xlu1 %v2469_v46, %s2214_s22 }
 0x245   : > { %v2472_v50 = vpack.c.bf16 %v700_v48, %v700_v48 }
 0x246   : > { %v692_v51 = vpop.permute.xlu1 %691 }
 0x247   : > { %v701_v52 = vadd.f32 %v692_v51, %v673_v49  ;;  %759 = vrot.lane.b32.xlu1 %v2472_v50, %s2214_s22 }
 0x249   : > { %v2475_v54 = vpack.c.bf16 %v701_v52, %v701_v52 }
 0x24a   : > { %v694_v55 = vpop.permute.xlu1 %693 }
 0x24b   : > { %v702_v56 = vadd.f32 %v694_v55, %v674_v53  ;;  %808 = vrot.lane.b32.xlu1 %v2475_v54, %s2214_s22 }
 0x24d   : > { %v2478_v57 = vpack.c.bf16 %v702_v56, %v702_v56 }
 0x24f   : > { %857 = vrot.lane.b32.xlu0 %v2478_v57, %s2214_s22 }
 0x2b5   : > { %v710_v58 = vpop.permute.xlu1 %709 }
 0x2b6   : > { %v716_v59 = vsel %vm711_vm3, %v710_v58, 0 }
 0x2b7   : > { %1834 = vmatpush3.bf16.xpose.msra.mxu0 %v716_v59 }
 0x2b8   : > { %1845 = vmatprep.subr.bf16.mxu0 %v2210_v6 }
 0x2b9   : > { %v760_v60 = vpop.permute.xlu1 %759 }
 0x2ba   : > { %v765_v61 = vsel %vm711_vm3, %v760_v60, 0 }
 0x2bb   : > { %1840 = vmatpush3.bf16.xpose.msra.mxu1 %v765_v61 }
 0x2bc   : > { %1851 = vmatprep.subr.bf16.mxu1 %v2210_v6 }
 0x2bd   : > { %v809_v62 = vpop.permute.xlu1 %808 }
 0x2be   : > { %v814_v63 = vsel %vm711_vm3, %v809_v62, 0  ;;  %1836 = vmatmul.mubr.msk.bf16.vlgmr.msra.gmra.mxu0 %vm711_vm3, %v2469_v46 }
 0x2bf   : > { %1846 = vmatpush3.bf16.xpose.msra.mxu0 %v814_v63  ;;  %1847 = vmatprep.mubr.msk.bf16.mxu0 %vm2211_vm2, %v2210_v6 }
 0x2c0   : > { %1857 = vmatprep.subr.bf16.mxu0 %v2210_v6 }
 0x2c1   : > { %v858_v0 = vpop.permute.xlu0 %857 }
 0x2c2   : > { %v863_v2 = vsel %vm711_vm3, %v858_v0, 0  ;;  %1842 = vmatmul.mubr.msk.bf16.vlgmr.msra.gmra.mxu1 %vm711_vm3, %v2472_v50 }
 0x2c3   : > { %1852 = vmatpush3.bf16.xpose.msra.mxu1 %v863_v2  ;;  %1853 = vmatprep.mubr.msk.bf16.mxu1 %vm2211_vm2, %v2210_v6 }
 0x2c4   : > { %1863 = vmatprep.subr.bf16.mxu1 %v2210_v6 }
 0x2c6   : > { %1848 = vmatmul.mubr.msk.bf16.vlgmr.msra.gmra.mxu0 %vm711_vm3, %v2475_v54 }
 0x2c7   : > { %1859 = vmatprep.mubr.msk.bf16.mxu0 %vm2211_vm2, %v2210_v6 }
 0x2ca   : > { %1854 = vmatmul.mubr.msk.bf16.vlgmr.msra.gmra.mxu1 %vm711_vm3, %v2478_v57 }
 0x2cb   : > { %1865 = vmatprep.mubr.msk.bf16.mxu1 %vm2211_vm2, %v2210_v6 }
 0x37e   : > { %v752_v4 = vpop.f32.mrf.mxu0 }
 0x37f   : > { %v753_v5 = vadd.f32 %v752_v4, %v707_v3 }
 0x380   : > { %v1837_v7 = vpop.f32.mrf.mxu0 }
 0x381   : > { %v905_v8 = vsel %vm711_vm3, %v753_v5, -inf }
 0x382   : > { %906 = vmax.xlane.f32.xlu1 %v905_v8  ;;  %v755_v9 = vpop.f32.mrf.mxu0  ;;  %v801_v10 = vpop.f32.mrf.mxu1 }
 0x383   : > { %v802_v11 = vadd.f32 %v801_v10, %v707_v3 }
 0x384   : > { %v1838_v12 = vpop.f32.mrf.mxu0  ;;  %v1843_v13 = vpop.f32.mrf.mxu1 }
 0x385   : > { %v908_v14 = vsel %vm711_vm3, %v802_v11, -inf  ;;  %v1151_v13 = vld [vmem:[%s2409_s24 + $0x4] sm:$0xf] }
 0x386   : > { %909 = vmax.xlane.f32.xlu0 %v908_v14  ;;  %v804_v15 = vpop.f32.mrf.mxu1  ;;  %v850_v16 = vpop.f32.mrf.mxu0  ;;  %v1204_v14 = vsel %vm958_vm4, %v1151_v13, 0  ;;  %v2024_v13 = vld [vmem:[%s2419_s19] sm:$0xff]  }
 0x387   : > { %v851_v17 = vadd.f32 %v850_v16, %v707_v3  ;;  %v1152_v15 = vld [vmem:[%s2409_s24 + $0x8] sm:$0xf] }
 0x388   : > { %v1844_v18 = vpop.f32.mrf.mxu1  ;;  %v1849_v19 = vpop.f32.mrf.mxu0 }
 0x389   : > { %v911_v20 = vsel %vm711_vm3, %v851_v17, -inf  ;;  %v1250_v18 = vsel %vm958_vm4, %v1152_v15, 0 }
 0x38a   : > { %v899_v21 = vpop.f32.mrf.mxu1  ;;  %912 = vmax.xlane.f32.xlu0 %v911_v20  ;;  %v853_v22 = vpop.f32.mrf.mxu0  ;;  %v1153_v20 = vld [vmem:[%s2409_s24 + $0xc] sm:$0xf] }
 0x38b   : > { %v900_v23 = vadd.f32 %v899_v21, %v707_v3 }
 0x38c   : > { %v1850_v24 = vpop.f32.mrf.mxu0  ;;  %v1855_v25 = vpop.f32.mrf.mxu1 }
 0x38d   : > { %v914_v26 = vsel %vm711_vm3, %v900_v23, -inf  ;;  %v1296_v24 = vsel %vm958_vm4, %v1153_v20, 0 }
 0x38e   : > { %915 = vmax.xlane.f32.xlu1 %v914_v26  ;;  %v902_v27 = vpop.f32.mrf.mxu1 }
 0x390   : > { %v1856_v28 = vpop.f32.mrf.mxu1 }
 0x39f   : > { %1002 = vrot.lane.b32.xlu1 %v2472_v50, %s2215_s28 }
 0x40b   : > { %v907_v29 = vpop.xlane.xlu1 %906 }
 0x40c   : > { %v917_v30 = vsub.f32 %v753_v5, %v907_v29 }
 0x40e   : > { %v921_v31 = vmul.f32 1.442695, %v917_v30 }
 0x40f   : > { %v910_v32 = vpop.xlane.xlu0 %909 }
 0x410   : > { %2027 = vpow2.f32 %v921_v31  ;;  %v918_v33 = vsub.f32 %v802_v11, %v910_v32  ;;  %v1150_v11 = vld [vmem:[%s2409_s24] sm:$0xf] }
 0x411   : > { %v1158_v12 = vsel %vm958_vm4, %v1150_v11, 0  ;;  %v2022_v11 = vld [vmem:[%s2419_s19 + $0x10] sm:$0xff]  }
 0x412   : > { %v923_v34 = vmul.f32 1.442695, %v918_v33 }
 0x413   : > { %v913_v47 = vpop.xlane.xlu0 %912 }
 0x414   : > { %2029 = vpow2.f32 %v923_v34  ;;  %v919_v48 = vsub.f32 %v851_v17, %v913_v47 }
 0x416   : > { %v925_v49 = vmul.f32 1.442695, %v919_v48 }
 0x417   : > { %v916_v35 = vpop.xlane.xlu1 %915 }
 0x418   : > { %v920_v36 = vsub.f32 %v900_v23, %v916_v35 }
 0x41a   : > { %v927_v37 = vmul.f32 1.442695, %v920_v36 }
 0x41b   : > { %v1003_v38 = vpop.permute.xlu1 %1002 }
 0x41c   : > { %2031 = vpow2.f32 %v927_v37  ;;  %v1008_v39 = vsel %vm958_vm4, %v1003_v38, 0 }
 0x41d   : > { %v2028_v40 = vpop.eup %2027  ;;  %1864 = vmatpush3.bf16.msra.mxu1 %v1008_v39  ;;  %2033 = vpow2.f32 %v925_v49 }
 0x41e   : > { %v929_v41 = vsel %vm711_vm3, %v2028_v40, 0.0  ;;  %1875 = vmatprep.subr.bf16.mxu1 %v2210_v6 }
 0x41f   : > { %930 = vadd.xlane.f32.xlu0 %v929_v41 }
 0x421   : > { %v2030_v42 = vpop.eup %2029 }
 0x422   : > { %v932_v43 = vsel %vm711_vm3, %v2030_v42, 0.0 }
 0x423   : > { %933 = vadd.xlane.f32.xlu1 %v932_v43 }
 0x429   : > { %v2032_v44 = vpop.eup %2031 }
 0x42a   : > { %v938_v45 = vsel %vm711_vm3, %v2032_v44, 0.0  ;;  %v2034_v50 = vpop.eup %2033 }
 0x42b   : > { %939 = vadd.xlane.f32.xlu1 %v938_v45  ;;  %v935_v51 = vsel %vm711_vm3, %v2034_v50, 0.0 }
 0x435   : > { %953 = vrot.lane.b32.xlu0 %v2469_v46, %s2215_s28 }
 0x43c   : > { %1050 = vrot.lane.b32.xlu1 %v2475_v54, %s2215_s28 }
 0x454   : > { %936 = vadd.xlane.f32.xlu0 %v935_v51 }
 0x46a   : > { %1098 = vrot.lane.b32.xlu0 %v2478_v57, %s2215_s28 }
 0x4a8   : > { %v931_v52 = vpop.xlane.xlu0 %930 }
 0x4a9   : > { %2035 = vrcp.f32 %v931_v52 }
 0x4ac   : > { %v954_v53 = vpop.permute.xlu0 %953  ;;  %v934_v55 = vpop.xlane.xlu1 %933 }
 0x4ad   : > { %v960_v46 = vsel %vm958_vm4, %v954_v53, 0  ;;  %2037 = vrcp.f32 %v934_v55 }
 0x4ae   : > { %1858 = vmatpush3.bf16.msra.mxu0 %v960_v46 }
 0x4af   : > { %1869 = vmatprep.subr.bf16.mxu0 %v2210_v6 }
 0x4b4   : > { %v940_v54 = vpop.xlane.xlu1 %939 }
 0x4b5   : > { %2039 = vrcp.f32 %v940_v54 }
 0x4b6   : > { %v2036_v56 = vpop.eup %2035 }
 0x4b7   : > { %v945_v58 = vmul.f32 %v2036_v56, %v2028_v40 }
 0x4b8   : > { %v1051_v59 = vpop.permute.xlu1 %1050 }
 0x4b9   : > { %v1056_v60 = vsel %vm958_vm4, %v1051_v59, 0  ;;  %v949_v61 = vpack.c.bf16 %v945_v58, %v945_v58 }
 0x4ba   : > { %v2038_v62 = vpop.eup %2037 }
 0x4bb   : > { %1860 = vmatmul.mubr.msk.bf16.vlgmr.msra.gmra.mxu0 %vm711_vm3, %v949_v61  ;;  %v946_v57 = vmul.f32 %v2038_v62, %v2030_v42 }
 0x4bc   : > { %1870 = vmatpush3.bf16.msra.mxu0 %v1056_v60  ;;  %1871 = vmatprep.mubr.msk.bf16.mxu0 %vm2211_vm2, %v2210_v6 }
 0x4bd   : > { %v950_v63 = vpack.c.bf16 %v946_v57, %v946_v57  ;;  %1881 = vmatprep.subr.bf16.mxu0 %v2210_v6 }
 0x4bf   : > { %1866 = vmatmul.mubr.msk.bf16.vlgmr.msra.gmra.mxu1 %vm711_vm3, %v950_v63 }
 0x4c0   : > { %1877 = vmatprep.mubr.msk.bf16.mxu1 %vm2211_vm2, %v2210_v6 }
 0x4c2   : > { %v2040_v0 = vpop.eup %2039 }
 0x4c3   : > { %v948_v3 = vmul.f32 %v2040_v0, %v2032_v44 }
 0x4c5   : > { %v952_v7 = vpack.c.bf16 %v948_v3, %v948_v3  ;;  %v2020_v3 = vld [vmem:[%s2414_s18] sm:$0xff]  }
 0x4dd   : > { %v937_v2 = vpop.xlane.xlu0 %936 }
 0x4de   : > { %2041 = vrcp.f32 %v937_v2  ;;  %v2019_v2 = vld [vmem:[%s2414_s18 + $0x8] sm:$0xff]  }
 0x4e1   : > { %v1099_v4 = vpop.permute.xlu0 %1098 }
 0x4e2   : > { %v1104_v5 = vsel %vm958_vm4, %v1099_v4, 0 }
 0x4e3   : > { %1876 = vmatpush3.bf16.msra.mxu1 %v1104_v5 }
 0x4e4   : > { %1887 = vmatprep.subr.bf16.mxu1 %v2210_v6 }
 0x4e6   : > { %1878 = vmatmul.mubr.msk.bf16.vlgmr.msra.gmra.mxu1 %vm711_vm3, %v952_v7 }
 0x4e7   : > { %1889 = vmatprep.mubr.msk.bf16.mxu1 %vm2211_vm2, %v2210_v6  ;;  %1888 = vmatpush3.bf16.msra.mxu1 %v1204_v14 }
 0x4e8   : > { %1899 = vmatprep.subr.bf16.mxu1 %v2210_v6 }
 0x4eb   : > { %v2042_v8 = vpop.eup %2041 }
 0x4ec   : > { %v947_v9 = vmul.f32 %v2042_v8, %v2034_v50 }
 0x4ee   : > { %v951_v10 = vpack.c.bf16 %v947_v9, %v947_v9 }
 0x4f0   : > { %1872 = vmatmul.mubr.msk.bf16.vlgmr.msra.gmra.mxu0 %vm711_vm3, %v951_v10  ;;  %v2021_v10 = vld [vmem:[%s2419_s19 + $0x18] sm:$0xff]  }
 0x4f1   : > { %1883 = vmatprep.mubr.msk.bf16.mxu0 %vm2211_vm2, %v2210_v6  ;;  %1882 = vmatpush3.bf16.msra.mxu0 %v1158_v12  ;;  %v2023_v12 = vld [vmem:[%s2419_s19 + $0x8] sm:$0xff]  }
 0x4f2   : > { %1893 = vmatprep.subr.bf16.mxu0 %v2210_v6 }
 0x57b   : > { %v996_v16 = vpop.f32.mrf.mxu0 }
 0x57c   : > { %v1146_v17 = vpack.c.bf16 %v996_v16, %v996_v16 }
 0x57d   : > { %v1861_v19 = vpop.f32.mrf.mxu0 }
 0x57e   : > { %1884 = vmatmul.mubr.msk.bf16.vlgmr.msra.gmra.mxu0 %vm711_vm3, %v1146_v17 }
 0x57f   : > { %v999_v21 = vpop.f32.mrf.mxu0  ;;  %v1044_v22 = vpop.f32.mrf.mxu1  ;;  %1894 = vmatpush3.bf16.msra.mxu0 %v1250_v18  ;;  %1895 = vmatprep.mubr.msk.bf16.mxu0 %vm2211_vm2, %v2210_v6 }
 0x580   : > { %v1147_v23 = vpack.c.bf16 %v1044_v22, %v1044_v22  ;;  %1905 = vmatprep.subr.bf16.mxu0 %v2210_v6 }
 0x581   : > { %v1862_v25 = vpop.f32.mrf.mxu0  ;;  %v1867_v26 = vpop.f32.mrf.mxu1 }
 0x582   : > { %1890 = vmatmul.mubr.msk.bf16.vlgmr.msra.gmra.mxu1 %vm711_vm3, %v1147_v23 }
 0x583   : > { %v1047_v27 = vpop.f32.mrf.mxu1  ;;  %1900 = vmatpush3.bf16.msra.mxu1 %v1296_v24  ;;  %1901 = vmatprep.mubr.msk.bf16.mxu1 %vm2211_vm2, %v2210_v6 }
 0x584   : > { %1913 = vmatprep.subr.bf16.mxu1 %v2210_v6 }
 0x585   : > { %v1868_v28 = vpop.f32.mrf.mxu1 }
 0x5a6   : > { %v1140_v29 = vpop.f32.mrf.mxu1 }
 0x5a7   : > { %v1149_v30 = vpack.c.bf16 %v1140_v29, %v1140_v29 }
 0x5a8   : > { %v1879_v31 = vpop.f32.mrf.mxu1 }
 0x5a9   : > { %1902 = vmatmul.mubr.msk.bf16.vlgmr.msra.gmra.mxu1 %vm711_vm3, %v1149_v30 }
 0x5aa   : > { %v1143_v32 = vpop.f32.mrf.mxu1  ;;  %1921 = vmatprep.mubr.msk.bf16.mxu1 %vm2211_vm2, %v2210_v6  ;;  %1914 = vmatpush3.bf16.msra.mxu1 %v2021_v10 }
 0x5ab   : > { %1915 = vmatprep.subr.bf16.mxu1 %v2210_v6 }
 0x5ac   : > { %v1880_v33 = vpop.f32.mrf.mxu1 }
 0x5ae   : > { %1916 = vmatpush3.bf16.msra.mxu1 %v2022_v11 }
 0x5af   : > { %1917 = vmatprep.subr.bf16.mxu1 %v2210_v6 }
 0x5b0   : > { %v1092_v34 = vpop.f32.mrf.mxu0 }
 0x5b1   : > { %v1148_v35 = vpack.c.bf16 %v1092_v34, %v1092_v34 }
 0x5b2   : > { %v1873_v36 = vpop.f32.mrf.mxu0  ;;  %1918 = vmatpush3.bf16.msra.mxu1 %v2023_v12 }
 0x5b3   : > { %1896 = vmatmul.mubr.msk.bf16.vlgmr.msra.gmra.mxu0 %vm711_vm3, %v1148_v35  ;;  %1919 = vmatprep.subr.bf16.mxu1 %v2210_v6 }
 0x5b4   : > { %v1095_v37 = vpop.f32.mrf.mxu0  ;;  %1909 = vmatprep.mubr.msk.bf16.mxu0 %vm2211_vm2, %v2210_v6  ;;  %1906 = vmatpush3.bf16.msra.mxu0 %v2019_v2 }
 0x5b5   : > { %1907 = vmatprep.subr.bf16.mxu0 %v2210_v6 }
 0x5b6   : > { %v1874_v38 = vpop.f32.mrf.mxu0  ;;  %1920 = vmatpush3.bf16.msra.mxu1 %v2024_v13 }
 0x5b8   : > { %1908 = vmatpush3.bf16.msra.mxu0 %v2020_v3 }
 0x63e   : > { %v1194_v39 = vpop.f32.mrf.mxu0 }
 0x63f   : > { %v1338_v53 = vsel %vm434_vm1, %v1194_v39, 0.0 }
 0x640   : > { %v1885_v40 = vpop.f32.mrf.mxu0 }
 0x642   : > { %v1197_v41 = vpop.f32.mrf.mxu0  ;;  %v1240_v42 = vpop.f32.mrf.mxu1 }
 0x643   : > { %v1339_v52 = vsel %vm434_vm1, %v1240_v42, 0.0 }
 0x644   : > { %v1886_v43 = vpop.f32.mrf.mxu0  ;;  %v1891_v44 = vpop.f32.mrf.mxu1  ;;  %v1340_v55 = vadd.f32 %v1339_v52, %v1338_v53 }
 0x646   : > { %v1243_v45 = vpop.f32.mrf.mxu1 }
 0x648   : > { %v1892_v47 = vpop.f32.mrf.mxu1 }
 0x669   : > { %v1332_v48 = vpop.f32.mrf.mxu1 }
 0x66a   : > { %v1343_v59 = vsel %vm434_vm1, %v1332_v48, 0.0 }
 0x66b   : > { %v1903_v49 = vpop.f32.mrf.mxu1 }
 0x66d   : > { %v1335_v50 = vpop.f32.mrf.mxu1 }
 0x66f   : > { %v1904_v51 = vpop.f32.mrf.mxu1 }
 0x673   : > { %v1286_v46 = vpop.f32.mrf.mxu0 }
 0x674   : > { %v1341_v54 = vsel %vm434_vm1, %v1286_v46, 0.0 }
 0x675   : > { %v1342_v56 = vadd.f32 %v1341_v54, %v1340_v55  ;;  %v1897_v58 = vpop.f32.mrf.mxu0 }
 0x677   : > { %v1344_v60 = vadd.f32 %v1343_v59, %v1342_v56  ;;  %v1289_v61 = vpop.f32.mrf.mxu0 }
 0x679   : > { %v1345_v62 = vadd.f32 %v1344_v60, %v2426_v1  ;;  %v1898_v57 = vpop.f32.mrf.mxu0 }
 0x67b   : > { %v1346_v63 = vmul.f32 %v1345_v62, %v1345_v62 }
 0x67d   : > { %v1347_v0 = vsel %vm434_vm1, %v1346_v63, 0.0 }
 0x67e   : > { %1348 = vadd.xlane.f32.xlu1 %v1347_v0 }
 0x707   : > { %v1349_v4 = vpop.xlane.xlu1 %1348 }
 0x708   : > { %v1350_v5 = vmul.f32 0.03125, %v1349_v4 }
 0x70a   : > { %v1351_v7 = vadd.f32 1e-05, %v1350_v5 }
 0x70c   : > { %2043 = vrsqrt.f32 %v1351_v7 }
 0x719   : > { %v2044_v1 = vpop.eup %2043 }
 0x71a   : > { %v1353_v8 = vmul.f32 %v2044_v1, %v1345_v62 }
 0x71c   : > { %v1354_v9 = vpack.c.bf16 %v1353_v8, %v1353_v8 }
 0x71e   : > { %1910 = vmatmul.mubr.msk.bf16.vlgmr.msra.gmra.mxu0 %vm434_vm1, %v1354_v9 }
 0x7de   : > { %v1408_v14 = vpop.f32.mrf.mxu0 }
 0x7df   : > { %1422 = vrot.lane.b32.xlu0 %v1408_v14, %s2216_s27  ;;  %v1736_v18 = vmul.f32 -1.442695, %v1408_v14 }
 0x7e0   : > { %v1911_v15 = vpop.f32.mrf.mxu0 }
 0x7e1   : > { %2045 = vpow2.f32 %v1736_v18 }
 0x7e2   : > { %v1411_v16 = vpop.f32.mrf.mxu0 }
 0x7e4   : > { %v1912_v17 = vpop.f32.mrf.mxu0 }
 0x7ee   : > { %v2046_v19 = vpop.eup %2045 }
 0x7ef   : > { %v1417_v20 = vadd.f32 1.0, %v2046_v19 }
 0x7f1   : > { %2047 = vrcp.f32 %v1417_v20 }
 0x7fe   : > { %v2048_v21 = vpop.eup %2047 }
 0x7ff   : > { %v1420_v22 = vmul.f32 %v2048_v21, %v1408_v14 }
 0x851   : > { %v1423_v23 = vpop.permute.xlu0 %1422 }
 0x852   : > { %v1425_v24 = vmul.f32 %v1423_v23, %v1420_v22 }
 0x854   : > { %v1426_v25 = vpack.c.bf16 %v1425_v24, %v1425_v24 }
 0x856   : > { %1922 = vmatmul.mubr.msk.bf16.vlgmr.msra.gmra.mxu1 %vm1459_vm5, %v1426_v25 }
 0x916   : > { %v1497_v6 = vpop.f32.mrf.mxu1 }
 0x917   : > { %v1503_v26 = vadd.f32 %v1497_v6, %v1345_v62 }
 0x918   : > { %v1923_v27 = vpop.f32.mrf.mxu1  ;;  %1508 = sbr.rel (%p1742_p4) target bundleno = 2695 (0xa87), region = 76 }
 0x919   : > { %1504 = vst.msk [vmem:[#allocation2] sm:$0xff] %vm434_vm1, %v1503_v26 }
 0x91a   : > { %v1500_v28 = vpop.f32.mrf.mxu1 }
 0x91c   : > { %v1924_v29 = vpop.f32.mrf.mxu1 }
 0x91d   : > { %v1509_v30 = vmul.f32 %v1503_v26, %v1503_v26  ;;  %v2049_v32 = vld [vmem:[%s2625_s8 + $0x8] sm:$0xff]   ;;  %v2217_v33 = vmov 0.0   ;;  %v2050_v34 = vld [vmem:[%s2625_s8] sm:$0xff]   ;;  %vm2218_vm6 = vmmov 0  }
 0x91e   : > { %1925 = vmatprep.subr.bf16.mxu0 %v2217_v33  ;;  %1929 = vmatprep.mubr.msk.bf16.mxu0 %vm2218_vm6, %v2217_v33 }
 0x91f   : > { %v1510_v31 = vsel %vm434_vm1, %v1509_v30, 0.0  ;;  %1926 = vmatpush3.bf16.msra.mxu0 %v2049_v32 }
 0x920   : > { %1511 = vadd.xlane.f32.xlu0 %v1510_v31  ;;  %1927 = vmatprep.subr.bf16.mxu0 %v2217_v33 }
 0x923   : > { %1928 = vmatpush3.bf16.msra.mxu0 %v2050_v34 }
 0x9a9   : > { %v1512_v35 = vpop.xlane.xlu0 %1511 }
 0x9aa   : > { %v1513_v36 = vmul.f32 0.03125, %v1512_v35 }
 0x9ac   : > { %v1514_v37 = vadd.f32 1e-05, %v1513_v36 }
 0x9ae   : > { %2051 = vrsqrt.f32 %v1514_v37 }
 0x9bb   : > { %v2052_v38 = vpop.eup %2051 }
 0x9bc   : > { %v1516_v39 = vmul.f32 %v2052_v38, %v1503_v26 }
 0x9be   : > { %v1517_v40 = vpack.c.bf16 %v1516_v39, %v1516_v39 }
 0x9c0   : > { %1930 = vmatmul.mubr.msk.bf16.vlgmr.msra.gmra.mxu0 %vm434_vm1, %v1517_v40 }
 0xa80   : > { %v1571_v41 = vpop.f32.mrf.mxu0 }
 0xa81   : > { %1577 = vst [vmem:[#allocation9] sm:$0xff] %v1571_v41 }
 0xa82   : > { %v1931_v42 = vpop.f32.mrf.mxu0 }
 0xa84   : > { %v1574_v43 = vpop.f32.mrf.mxu0 }
 0xa86   : > { %v1932_v44 = vpop.f32.mrf.mxu0 }
 0xa87 PF: > { %p1963_p12 = scmp.eq.s32.totalorder %s2289_s13, 1  ;;  %s2219_s12 = smov [#allocation9]  }
 0xa88   : > { %s1585_s26 = sshll.u32 %s2219_s12, 4  ;;  %s1586_s26 = int_to_ptr.vmem [resolvable:$true] %s1585_s26 }
 0xa89   : > { %s2133_s19 = scalar_lea.vmem %s1586_s26, 128  ;;  %p2140_p10 = scmp.lt.s32.totalorder %s1586_s26, %s1586_s26 }
 0xa8a   : > { %p2134_p2 = scmp.ne.s32.totalorder %s1586_s26, %s2133_s19  ;;  %p2141_p9 = scmp.lt.s32.totalorder %s2133_s19, %s2133_s19 }
 0xa8c   : > { %p2135_p3 = pnand %p2134_p2, %p1963_p12  ;;  %p2142_p13 = por %p2141_p9, %p2140_p10 }
 0xa8e   : > { %p2136_p5 = pneg %p2135_p3 }
 0xa90   : > { %p2143_p0 = pnand %p2142_p13, %p2136_p5 }
 0xa92   : > { %2146 = shalt.err (!%p2143_p0)
}
 0xa93   : > { %1944 = dma.vmem_to_hbm [thread:$0]  (%p1963_p12), %s1586_s26, 128, %s2626_s9, [#allocation5]  }
 0xa94   : > { %2186 = dma.done.wait (%p1963_p12), [#allocation5], 128  }
 0xa95   : > { %2188 = vsyncadd (%p1963_p12), [#allocation5], 4294967168 }
 0xa96 PF: > { %p19_p1 = scmp.ge.s32.totalorder %s2292_s14, 4   ;;  %s2644_s30 = smov %s2195_s10 }
 0xa97   : > { %s2645_s10 = smov %s2199_s11  ;;  %s2646_s11 = smov %s2302_s17 }
 0xa98   : > { %s2647_s12 = smov %s2292_s14  ;;  %21 = sbr.rel (!%p19_p1) target bundleno = 4 (0x4), region = 117 }
 0xa9d   :  { %1598 = vsyncpa [#allocation4], 1 }
 0xa9e   :  { %1600 = vsyncpa [#allocation4 + $0x1], 1 }
 0xa9f   :  { %1601 = vsyncpa [#allocation7], 1 }
 0xaa0   :  { %1602 = vsyncpa [#allocation5], 1 }
 0xaa1   :  { %1604 = vsyncpa [#allocation5 + $0x1], 1 }

</bundles_post_ra>
